<compile_context>
chip_gen: v7x
topology: tpu7x:2x2x1
jax: 0.10.0
libtpu: 0.0.40
codegen_flags: <defaults>
</compile_context>

<pallas_src>
import jax
import jax.numpy as jnp
from jax.experimental import pallas as pl
from jax.experimental.pallas import tpu as pltpu


def _zero_times_kernel(x_ref, o_ref):
    # Faithful to torch's x * 0.0 (NaN/Inf propagate, negative x -> -0.0).
    o_ref[...] = x_ref[...] * jnp.asarray(0.0, dtype=x_ref.dtype)


# ----------------------------- configuration --------------------------------
_LANE_CANDIDATES = (4096, 2048, 1024, 512, 256, 128)  # wide, lane-dense last dims
_SMALL_THRESHOLD = 1 << 17            # < 128K elements: single un-gridded block
_MAX_BLOCK_BYTES = 2 * 1024 * 1024    # ~2 MiB per block: (1 in + 1 out) x 2
                                      # double buffers = ~8 MiB, safely inside
                                      # every chip's scoped-VMEM default.


def _zero_times_small(x):
    """Single un-gridded block; no padding, no grid-step overhead."""
    n = x.size
    if n % 128 == 0:
        # Lane-dense 2D view keeps stores full-width (unmasked vst).
        x2 = x.reshape(n // 128, 128)
        out = pl.pallas_call(
            _zero_times_kernel,
            out_shape=jax.ShapeDtypeStruct(x2.shape, x2.dtype),
        )(x2)
        return out.reshape(x.shape)
    # Irregular small shape: full-array block (always a legal block shape).
    return pl.pallas_call(
        _zero_times_kernel,
        out_shape=jax.ShapeDtypeStruct(x.shape, x.dtype),
    )(x)


def _pick_block_rows(rows, width, itemsize):
    """Largest row-block under the per-buffer VMEM budget (multiple of 32)."""
    max_rows = max(32, _MAX_BLOCK_BYTES // (width * itemsize))
    if rows <= max_rows:
        return rows  # block spans the full row dim -> always a legal shape
    return max(32, (max_rows // 32) * 32)


def _zero_times_tiled(x2d, block_rows, width):
    rows = x2d.shape[0]
    grid = (pl.cdiv(rows, block_rows),)
    return pl.pallas_call(
        _zero_times_kernel,
        out_shape=jax.ShapeDtypeStruct(x2d.shape, x2d.dtype),
        grid=grid,
        in_specs=[pl.BlockSpec((block_rows, width), lambda i: (i, 0))],
        out_specs=pl.BlockSpec((block_rows, width), lambda i: (i, 0)),
        compiler_params=pltpu.CompilerParams(
            dimension_semantics=("parallel",),  # lets v7x use both TensorCores
        ),
    )(x2d)


def zero_times(x):
    """Pallas implementation of ZeroTimes.forward: x * 0.0, same shape/dtype."""
    n = x.size
    if n == 0 or x.ndim == 0:
        return x * jnp.asarray(0.0, dtype=x.dtype)

    # Tiny inputs: fixed overhead dominates; use one un-gridded block.
    if n < _SMALL_THRESHOLD:
        return _zero_times_small(x)

    itemsize = jnp.dtype(x.dtype).itemsize

    # Widest lane-dense last dim (multiple of 128) that divides n exactly:
    # no padding copy, unmasked wide stores, fewer grid steps.
    width = next((w for w in _LANE_CANDIDATES if n % w == 0), None)
    if width is None:
        # Irregular total size (not a multiple of 128) -- rare fallback.
        if n * itemsize <= _MAX_BLOCK_BYTES:
            return _zero_times_small(x)
        # TODO(synk): avoid the full-array pad copy for large irregular sizes.
        width = 128
        n_pad = (-n) % width
        x_flat = jnp.concatenate(
            [x.reshape(-1), jnp.zeros((n_pad,), dtype=x.dtype)])
        rows = x_flat.size // width
        block_rows = _pick_block_rows(rows, width, itemsize)
        out = _zero_times_tiled(x_flat.reshape(rows, width), block_rows, width)
        return out.reshape(-1)[:n].reshape(x.shape)

    rows = n // width
    block_rows = _pick_block_rows(rows, width, itemsize)
    out2d = _zero_times_tiled(x.reshape(rows, width), block_rows, width)
    return out2d.reshape(x.shape)


if __name__ == "__main__":
    key = jax.random.PRNGKey(0)

    # Small NCHW input (matches the module's typical usage): hits the
    # single-block fast path.
    x = jax.random.normal(key, (2, 4, 16, 16), dtype=jnp.float32)
    y = jax.block_until_ready(zero_times(x))
    assert y.shape == x.shape and y.dtype == x.dtype
    assert jnp.array_equal(y, x * 0.0)

    # Irregular tiny shape (not a multiple of 128): full-array block fallback.
    x_odd = jax.random.normal(key, (3, 5, 7), dtype=jnp.float32)
    y_odd = jax.block_until_ready(zero_times(x_odd))
    assert y_odd.shape == x_odd.shape and jnp.array_equal(y_odd, x_odd * 0.0)

    # Moderately sized input: exercises the tiled, lane-dense grid path.
    x_big = jax.random.normal(key, (256, 512), dtype=jnp.float32)
    y_big = jax.block_until_ready(zero_times(x_big))
    assert y_big.shape == x_big.shape and y_big.dtype == x_big.dtype
    assert jnp.array_equal(y_big, x_big * 0.0)

    print("KERNEL_OK")
</pallas_src>

<mosaic_0001>
module attributes {stable_mosaic.version = 11 : i64} {
  func.func @_zero_times_kernel(%arg0: memref<16x128xf32, #tpu.memory_space<vmem>>, %arg1: memref<16x128xf32, #tpu.memory_space<vmem>>) attributes {dimension_semantics = [], scalar_prefetch = 0 : i64, scratch_operands = 0 : i64, tpu.core_type = #tpu.core_type<tc>} {
    %c0 = arith.constant 0 : index
    %c0_0 = arith.constant 0 : index
    %0 = vector.load %arg0[%c0, %c0_0] : memref<16x128xf32, #tpu.memory_space<vmem>>, vector<16x128xf32>
    %cst = arith.constant 0.000000e+00 : f32
    %1 = vector.broadcast %cst : f32 to vector<16x128xf32>
    %2 = arith.mulf %0, %1 : vector<16x128xf32>
    %c0_1 = arith.constant 0 : index
    %c0_2 = arith.constant 0 : index
    %3 = vector.load %arg1[%c0_1, %c0_2] : memref<16x128xf32, #tpu.memory_space<vmem>>, vector<16x128xf32>
    tpu.vector_store %arg1[%c0_1, %c0_2], %2 {strides = array<i32>} : memref<16x128xf32, #tpu.memory_space<vmem>>, vector<16x128xf32>,
    return
  }
}

</mosaic_0001>

<bundles_post_ra>
// kernel: tpu_custom_call.1
= control target key start
LH: loop header
LB: loop body
LE: loop exit
PB: predicated region body
PF: predicated region fallthrough
CT: control target
= control target key end

     0   :  { %6 = vsyncpa [#allocation3], 0  ;;  %s136_s0 = inlined_call_operand.hbm [shape: f32[16,128], index: 0, kind: input, shape index: {}]   ;;  %s137_s1 = inlined_call_operand.hbm [shape: f32[16,128], index: 1, kind: output, shape index: {}]  }
   0x1   :  { %7 = vsyncpa [#allocation4], 0  ;;  %s98_s6 = smov [#allocation2]   ;;  %s50_s10 = scalar_lea.hbm %s136_s0, 256 }
   0x2   :  { %s13_s7 = sshll.u32 %s98_s6, 4  ;;  %p51_p0 = scmp.ne.s32.totalorder %s136_s0, %s50_s10  ;;  %s14_s7 = int_to_ptr.vmem [resolvable:$true] %s13_s7 }
   0x3   :  { %p54_p1 = scmp.lt.u32.totalorder %s50_s10, %s136_s0 }
   0x5   :  { %p56_p2 = pnand %p54_p1, %p51_p0 }
   0x7   :  { %59 = shalt.err (!%p56_p2)
}
   0x8   :  { %s60_s15 = scalar_lea.vmem %s14_s7, 256  ;;  %p65_p4 = scmp.lt.s32.totalorder %s14_s7, %s14_s7 }
   0x9   :  { %p61_p3 = scmp.ne.s32.totalorder %s14_s7, %s60_s15  ;;  %p66_p5 = scmp.lt.s32.totalorder %s60_s15, %s60_s15 }
   0xb   :  { %p67_p6 = por %p66_p5, %p65_p4 }
   0xd   :  { %p68_p7 = pnand %p67_p6, %p61_p3 }
   0xf   :  { %71 = shalt.err (!%p68_p7)
}
  0x10   :  { %s99_s16 = smov 128   ;;  %s100_s17 = smov 8  }
  0x11   :  { %19 = dma.hbm_to_vmem [thread:$0]  %s136_s0, 256, %s14_s7, [#allocation3], %s99_s16, %s99_s16, %s100_s17  }
  0x12   :  { %94 = dma.done.wait [#allocation3], 256  }
  0x13   :  { %95 = vsyncadd [#allocation3], 4294967040  ;;  %s101_s20 = smov [#allocation5]   ;;  %v23_v0 = vld [vmem:[#allocation2] sm:$0xff]  ;;  %v24_v1 = vld [vmem:[#allocation2 + $0x8] sm:$0xff] }
  0x14   :  { %s34_s21 = sshll.u32 %s101_s20, 4  ;;  %v25_v2 = vmul.f32 0.0, %v23_v0  ;;  %v26_v3 = vmul.f32 0.0, %v24_v1  ;;  %s35_s21 = int_to_ptr.vmem [resolvable:$true] %s34_s21 }
  0x15   :  { %s72_s22 = scalar_lea.vmem %s35_s21, 256  ;;  %p77_p9 = scmp.lt.s32.totalorder %s35_s21, %s35_s21 }
  0x16   :  { %27 = vst [vmem:[#allocation5] sm:$0xff] %v25_v2  ;;  %28 = vst [vmem:[#allocation5 + $0x8] sm:$0xff] %v26_v3  ;;  %p73_p8 = scmp.ne.s32.totalorder %s35_s21, %s72_s22  ;;  %p78_p10 = scmp.lt.s32.totalorder %s72_s22, %s72_s22 }
  0x18   :  { %p79_p11 = por %p78_p10, %p77_p9 }
  0x1a   :  { %p80_p12 = pnand %p79_p11, %p73_p8 }
  0x1c   :  { %83 = shalt.err (!%p80_p12)
}
  0x1d   :  { %s84_s24 = scalar_lea.hbm %s137_s1, 256 }
  0x1e   :  { %p85_p13 = scmp.ne.s32.totalorder %s137_s1, %s84_s24  ;;  %p88_p0 = scmp.lt.u32.totalorder %s84_s24, %s137_s1 }
  0x20   :  { %p90_p1 = pnand %p88_p0, %p85_p13 }
  0x22   :  { %93 = shalt.err (!%p90_p1)
}
  0x23   :  { %40 = dma.vmem_to_hbm [thread:$0]  %s35_s21, 256, %s137_s1, [#allocation4], %s99_s16, %s99_s16, %s100_s17  }
  0x24   :  { %96 = dma.done.wait [#allocation4], 256  }
  0x25   :  { %97 = vsyncadd [#allocation4], 4294967040 }
  0x26   :  { %44 = vsyncpa [#allocation3], 1 }
  0x27   :  { %45 = vsyncpa [#allocation4], 1 }

</bundles_post_ra>
